<compile_context>
chip_gen: v5e
topology: v5e:2x2
jax: 0.10.0
libtpu: 0.0.40
codegen_flags: <defaults>
</compile_context>

<pallas_src>
import functools

import jax
import jax.numpy as jnp
from jax.experimental import pallas as pl
from jax.experimental.pallas import tpu as pltpu


_MIB = 1024 * 1024
_TILE_VMEM_BUDGET = 40 * _MIB   # per-step tile working-set cap (v7x: 64 MiB phys)


def _round_up(v, m):
    return ((v + m - 1) // m) * m


def _softplus_f32(z):
    # torch.nn.Softplus defaults: beta=1, threshold=20 (z > 20 -> identity).
    # exp(z) may overflow for masked-out z, but jnp.where discards it (no NaN).
    return jnp.where(z > 20.0, z, jnp.log1p(jnp.exp(z)))


# ---------------------------------------------------------------------------
# Kernel bodies
# ---------------------------------------------------------------------------
def _kernel_fused(x_ref, w_ref, b_ref, o_ref):
    """Single K tile: matmul + bias + softplus in one step, no scratch."""
    z = jnp.dot(x_ref[...], w_ref[...], preferred_element_type=jnp.float32)
    z = z + b_ref[...]
    o_ref[...] = _softplus_f32(z).astype(o_ref.dtype)


def _kernel_acc_scratch(x_ref, w_ref, b_ref, o_ref, acc_ref):
    """K-tiled, bf16 output: f32 VMEM accumulator, finalize on last k step."""
    k = pl.program_id(2)

    @pl.when(k == 0)
    def _init():
        acc_ref[...] = jnp.zeros_like(acc_ref)

    acc_ref[...] += jnp.dot(x_ref[...], w_ref[...],
                            preferred_element_type=jnp.float32)

    @pl.when(k == pl.num_programs(2) - 1)
    def _finalize():
        z = acc_ref[...] + b_ref[...]
        o_ref[...] = _softplus_f32(z).astype(o_ref.dtype)


def _kernel_acc_inplace(x_ref, w_ref, b_ref, o_ref):
    """K-tiled, f32 output: accumulate directly into the resident out block
    (saves the tm*tn*4 B scratch and the finalize VMEM->VMEM copy)."""
    k = pl.program_id(2)

    @pl.when(k == 0)
    def _init():
        o_ref[...] = jnp.zeros_like(o_ref)

    o_ref[...] += jnp.dot(x_ref[...], w_ref[...],
                          preferred_element_type=jnp.float32)

    @pl.when(k == pl.num_programs(2) - 1)
    def _finalize():
        o_ref[...] = _softplus_f32(o_ref[...] + b_ref[...])


# ---------------------------------------------------------------------------
# One-time parameter preparation (hoisted out of the per-call path)
# ---------------------------------------------------------------------------
def prepare_params(w, b, *, use_bf16=True, max_tn=1024, max_tk=512):
    """Transpose + pad + cast the weights/bias once; pick N/K tiling.

    w : (enc_dim, input_dim)  -- PyTorch nn.Linear weight layout
    b : (enc_dim,)
    Returns (w_padded, b_padded, meta) where meta holds static tiling info.
    """
    N, K = w.shape
    in_dtype = jnp.bfloat16 if use_bf16 else jnp.float32
    in_itemsize = 2 if use_bf16 else 4

    Kp = _round_up(K, 128)
    Np = _round_up(N, 128)

    # N tiling: one big lane-dense tile if it fits max_tn, but keep >= 2 N
    # tiles when Np is large enough so the second TensorCore (v7x) has work.
    if Np <= max_tn:
        tn = Np
        if Np >= 256 and Np % 256 == 0:
            tn = Np // 2
    else:
        tn = max_tn
        Np = _round_up(Np, tn)

    # K tiling: collapse K into a single tile when the double-buffered weight
    # stream still fits comfortably in VMEM; W is then read from HBM exactly
    # once and the k-axis accumulator revisit disappears.
    if 2 * Kp * tn * in_itemsize <= _TILE_VMEM_BUDGET // 2:
        tk = Kp
    else:
        tk = min(Kp, max_tk)
        Kp = _round_up(Kp, tk)

    w_t = jnp.transpose(w).astype(in_dtype)            # (K, N)
    if (Kp, Np) == (K, N):
        wp = w_t
    else:
        wp = jnp.zeros((Kp, Np), in_dtype).at[:K, :N].set(w_t)
    bp = jnp.zeros((1, Np), jnp.float32).at[0, :N].set(
        jnp.reshape(b, (N,)).astype(jnp.float32))

    meta = dict(n=N, k=K, tn=tn, tk=tk, use_bf16=use_bf16)
    return wp, bp, meta


# ---------------------------------------------------------------------------
# Forward pass
# ---------------------------------------------------------------------------
def simple_encoder(x, wp, bp, *, n, k, tn, tk, use_bf16=True, max_tm=1024):
    """softplus(x @ W^T + b) with pre-padded/cast weights from prepare_params.

    x  : (B, input_dim) float32
    wp : (Kp, Np) padded, transposed weight (bf16 if use_bf16)
    bp : (1, Np) padded bias, float32
    """
    B, Kin = x.shape
    assert Kin == k, "input feature dim mismatch"
    Kp, Np = wp.shape
    in_dtype = wp.dtype
    in_itemsize = jnp.dtype(in_dtype).itemsize
    out_dtype = jnp.bfloat16 if use_bf16 else jnp.float32
    out_itemsize = jnp.dtype(out_dtype).itemsize

    # ---- M tiling (per-call: depends on batch) -----------------------------
    Mp = _round_up(B, 16)          # 16 covers bf16 sublane packing
    tm = min(Mp, max_tm)

    def tile_bytes(tm_):
        by = 2 * tm_ * tk * in_itemsize        # x double buffer
        by += 2 * tk * tn * in_itemsize        # W double buffer
        by += 2 * tm_ * tn * out_itemsize      # out double buffer
        by += 2 * tn * 4                       # bias slices
        if Kp // tk > 1 and use_bf16:
            by += tm_ * tn * 4                 # f32 accumulator scratch
        return by

    while tile_bytes(tm) > _TILE_VMEM_BUDGET and tm > 16:
        tm = max(16, ((tm // 2) // 16) * 16)
    Mp = _round_up(_round_up(B, 16), tm)

    nm, nn, nk = Mp // tm, Np // tn, Kp // tk

    # ---- pad x only when needed ---------------------------------------------
    if (B, Kin) == (Mp, Kp):
        xp = x.astype(in_dtype)
    else:
        xp = jnp.zeros((Mp, Kp), in_dtype).at[:B, :Kin].set(x.astype(in_dtype))

    # Explicit VMEM budget: >= working set, capped at 48 MiB (v7x-safe).
    vmem_limit = int(min(48 * _MIB, max(32 * _MIB, tile_bytes(tm) + 8 * _MIB)))

    cost = pl.CostEstimate(
        flops=2 * Mp * Np * Kp,
        transcendentals=2 * Mp * Np,                    # exp + log1p
        bytes_accessed=(nn * Mp * Kp * in_itemsize      # x re-streamed per N tile
                        + nm * Kp * Np * in_itemsize    # W re-streamed per M tile
                        + Np * 4                        # bias
                        + Mp * Np * out_itemsize),      # output
    )

    if nk == 1:
        # K collapsed: fused matmul + bias + softplus, no accumulator at all.
        out = pl.pallas_call(
            _kernel_fused,
            out_shape=jax.ShapeDtypeStruct((Mp, Np), out_dtype),
            grid=(nm, nn),
            in_specs=[
                pl.BlockSpec((tm, tk), lambda i, j: (i, 0)),   # x (VMEM resident over j)
                pl.BlockSpec((tk, tn), lambda i, j: (0, j)),   # W^T tile (streamed once)
                pl.BlockSpec((1, tn), lambda i, j: (0, j)),    # bias slice (tiny)
            ],
            out_specs=pl.BlockSpec((tm, tn), lambda i, j: (i, j)),
            compiler_params=pltpu.CompilerParams(
                dimension_semantics=("parallel", "parallel"),
                vmem_limit_bytes=vmem_limit,
            ),
            cost_estimate=cost,
        )(xp, wp, bp)
    else:
        kernel = _kernel_acc_scratch if use_bf16 else _kernel_acc_inplace
        scratch = [pltpu.VMEM((tm, tn), jnp.float32)] if use_bf16 else []
        out = pl.pallas_call(
            kernel,
            out_shape=jax.ShapeDtypeStruct((Mp, Np), out_dtype),
            grid=(nm, nn, nk),
            in_specs=[
                pl.BlockSpec((tm, tk), lambda i, j, kk: (i, kk)),
                pl.BlockSpec((tk, tn), lambda i, j, kk: (kk, j)),
                pl.BlockSpec((1, tn), lambda i, j, kk: (0, j)),
            ],
            out_specs=pl.BlockSpec((tm, tn), lambda i, j, kk: (i, j)),
            scratch_shapes=scratch,
            compiler_params=pltpu.CompilerParams(
                dimension_semantics=("parallel", "parallel", "arbitrary"),
                vmem_limit_bytes=vmem_limit,
            ),
            cost_estimate=cost,
        )(xp, wp, bp)

    if (Mp, Np) != (B, n):
        out = out[:B, :n]
    return out


if __name__ == "__main__":
    # Small shapes consistent with the module: batch=8, input_dim=32, enc_dim=32.
    # NOTE: at this size a fused XLA op would win; the kernel is structured
    # (tiled, padded, bf16, K/M-collapsed skinny regime) to scale to real shapes.
    B, input_dim, enc_dim = 8, 32, 32

    key = jax.random.PRNGKey(0)
    kx, kw, kb = jax.random.split(key, 3)

    # nn.Linear default init: U(-1/sqrt(in_features), 1/sqrt(in_features)).
    bound = 1.0 / (input_dim ** 0.5)
    w = jax.random.uniform(kw, (enc_dim, input_dim), jnp.float32, -bound, bound)
    b = jax.random.uniform(kb, (enc_dim,), jnp.float32, -bound, bound)
    x = jax.random.normal(kx, (B, input_dim), jnp.float32)

    # One-time weight prep (transpose + pad + bf16 cast), out of the call path.
    wp, bp, meta = prepare_params(w, b, use_bf16=True)
    enc = jax.jit(functools.partial(simple_encoder, **meta))
    out = jax.block_until_ready(enc(x, wp, bp))
    assert out.shape == (B, enc_dim)
    out_f32 = out.astype(jnp.float32)

    # Matched-precision reference: bf16 matmul, f32 accumulate/bias/softplus,
    # bf16 output cast.
    z_bf16 = jnp.dot(x.astype(jnp.bfloat16), jnp.transpose(w).astype(jnp.bfloat16),
                     preferred_element_type=jnp.float32) + b[None, :]
    ref_matched = _softplus_f32(z_bf16).astype(jnp.bfloat16).astype(jnp.float32)
    # Module-semantics (full f32) reference.
    ref_f32 = _softplus_f32(x @ jnp.transpose(w) + b[None, :])

    assert jnp.allclose(out_f32, ref_matched, atol=1e-2, rtol=1e-2), \
        "mismatch vs matched-precision reference"
    assert jnp.allclose(out_f32, ref_f32, atol=3e-2, rtol=3e-2), \
        "mismatch vs f32 module reference"

    print("KERNEL_OK")
</pallas_src>

<mosaic_0001>
module attributes {stable_mosaic.version = 11 : i64} {
  func.func @_kernel_fused(%arg0: i32, %arg1: i32, %arg2: memref<16x128xbf16, #tpu.memory_space<vmem>>, %arg3: memref<128x128xbf16, #tpu.memory_space<vmem>>, %arg4: memref<1x128xf32, #tpu.memory_space<vmem>>, %arg5: memref<16x128xbf16, #tpu.memory_space<vmem>>) attributes {dimension_semantics = [#tpu.dimension_semantics<parallel>, #tpu.dimension_semantics<parallel>], iteration_bounds = array<i64: 1, 1>, scalar_prefetch = 0 : i64, scratch_operands = 0 : i64, tpu.core_type = #tpu.core_type<tc>, window_params = [{transform_indices = @transform_0, window_bounds = array<i64: 16, 128>}, {transform_indices = @transform_1, window_bounds = array<i64: 128, 128>}, {transform_indices = @transform_2, window_bounds = array<i64: 1, 128>}, {transform_indices = @transform_3, window_bounds = array<i64: 16, 128>}]} {
    %c0 = arith.constant 0 : index
    %c0_0 = arith.constant 0 : index
    %0 = vector.load %arg2[%c0, %c0_0] : memref<16x128xbf16, #tpu.memory_space<vmem>>, vector<16x128xbf16>
    %c0_1 = arith.constant 0 : index
    %c0_2 = arith.constant 0 : index
    %1 = vector.load %arg3[%c0_1, %c0_2] : memref<128x128xbf16, #tpu.memory_space<vmem>>, vector<128x128xbf16>
    %cst = arith.constant dense<0.000000e+00> : vector<16x128xf32>
    %2 = tpu.matmul %0, %1, %cst {dimension_numbers = #tpu.dot_dimension_numbers<[1], [0], [0], [1], [0, 0, 1, 1], [], []>} : vector<16x128xbf16>, vector<128x128xbf16>, vector<16x128xf32> -> vector<16x128xf32>
    %c0_3 = arith.constant 0 : index
    %c0_4 = arith.constant 0 : index
    %3 = vector.load %arg4[%c0_3, %c0_4] : memref<1x128xf32, #tpu.memory_space<vmem>>, vector<1x128xf32>
    %4 = vector.broadcast %3 : vector<1x128xf32> to vector<16x128xf32>
    %5 = arith.addf %2, %4 : vector<16x128xf32>
    %cst_5 = arith.constant 2.000000e+01 : f32
    %6 = vector.broadcast %cst_5 : f32 to vector<16x128xf32>
    %7 = arith.cmpf ogt, %5, %6 : vector<16x128xf32>
    %8 = math.exp %5 : vector<16x128xf32>
    %9 = math.log1p %8 : vector<16x128xf32>
    %10 = arith.select %7, %5, %9 : vector<16x128xi1>, vector<16x128xf32>
    %11 = arith.truncf %10 : vector<16x128xf32> to vector<16x128xbf16>
    %c0_6 = arith.constant 0 : index
    %c0_7 = arith.constant 0 : index
    %12 = vector.load %arg5[%c0_6, %c0_7] : memref<16x128xbf16, #tpu.memory_space<vmem>>, vector<16x128xbf16>
    tpu.vector_store %arg5[%c0_6, %c0_7], %11 {strides = array<i32>} : memref<16x128xbf16, #tpu.memory_space<vmem>>, vector<16x128xbf16>,
    return
  }
  func.func @transform_0(%arg0: i32, %arg1: i32) -> (i32, i32) {
    %c0_i32 = arith.constant 0 : i32
    %c0_i32_0 = arith.constant 0 : i32
    return %arg0, %c0_i32 : i32, i32
  }
  func.func @transform_1(%arg0: i32, %arg1: i32) -> (i32, i32) {
    %c0_i32 = arith.constant 0 : i32
    %c0_i32_0 = arith.constant 0 : i32
    return %c0_i32, %arg1 : i32, i32
  }
  func.func @transform_2(%arg0: i32, %arg1: i32) -> (i32, i32) {
    %c0_i32 = arith.constant 0 : i32
    %c0_i32_0 = arith.constant 0 : i32
    return %c0_i32, %arg1 : i32, i32
  }
  func.func @transform_3(%arg0: i32, %arg1: i32) -> (i32, i32) {
    %c0_i32 = arith.constant 0 : i32
    return %arg0, %arg1 : i32, i32
  }
}

</mosaic_0001>

<bundles_post_ra>
// kernel: simple_encoder.1
= control target key start
LH: loop header
LB: loop body
LE: loop exit
PB: predicated region body
PF: predicated region fallthrough
CT: control target
= control target key end

     0   :  { %8 = vsyncpa [#allocation3], 0  ;;  %s243_s15 = smov [#allocation2]   ;;  %s244_s17 = smov 64   ;;  %s278_s0 = inlined_call_operand.vmem [shape: bf16[16,128], index: 0, kind: input, shape index: {}]   ;;  %s279_s1 = inlined_call_operand.hbm [shape: bf16[128,128], index: 1, kind: input, shape index: {}]   ;;  %s280_s2 = inlined_call_operand.vmem [shape: f32[1,128], index: 2, kind: input, shape index: {}]   ;;  %s281_s3 = inlined_call_operand.vmem [shape: bf16[16,128], index: 3, kind: output, shape index: {}]  }
   0x1   :  { %s15_s14 = sshll.u32 %s279_s1, 4  ;;  %s17_s16 = sshll.u32 %s243_s15, 4  ;;  %s16_s14 = int_to_ptr.hbm [resolvable:$true] %s15_s14  ;;  %s18_s16 = int_to_ptr.vmem [resolvable:$true] %s17_s16 }
   0x2   :  { %s245_s18 = smov 4  }
   0x3   :  { %23 = dma.hbm_to_vmem [thread:$0]  %s16_s14, 1024, %s18_s16, [#allocation3], %s244_s17, %s244_s17, %s245_s18  }
   0x4   :  { %241 = dma.done.wait [#allocation3], 1024  }
   0x5   :  { %242 = vsyncadd [#allocation3], 4294966272  ;;  %v199_v0 = vld [vmem:[#allocation2 + $0x38] sm:$0xff]  ;;  %v198_v1 = vld [vmem:[#allocation2 + $0x30] sm:$0xff] }
   0x6   :  { %106 = vmatpush.bf16.msra.mxu0 %v199_v0  ;;  %v197_v2 = vld [vmem:[#allocation2 + $0x28] sm:$0xff]  ;;  %v196_v3 = vld [vmem:[#allocation2 + $0x20] sm:$0xff]  ;;  %v195_v4 = vld [vmem:[#allocation2 + $0x18] sm:$0xff] }
   0x7   :  { %v194_v5 = vld [vmem:[#allocation2 + $0x10] sm:$0xff]  ;;  %v193_v6 = vld [vmem:[#allocation2 + $0x8] sm:$0xff]  ;;  %v192_v7 = vld [vmem:[#allocation2] sm:$0xff] }
   0x8   :  { %v191_v8 = vld [vmem:[%s278_s0] sm:$0xff] }
   0x9   :  { %v208_v9 = vld [vmem:[%s280_s2] ss:$0 sm:$0xff] }
   0xa   :  { %107 = vmatpush.bf16.msra.mxu0 %v198_v1 }
   0xe   :  { %108 = vmatpush.bf16.msra.mxu0 %v197_v2 }
  0x12   :  { %109 = vmatpush.bf16.msra.mxu0 %v196_v3 }
  0x16   :  { %110 = vmatpush.bf16.msra.mxu0 %v195_v4 }
  0x1a   :  { %111 = vmatpush.bf16.msra.mxu0 %v194_v5 }
  0x1e   :  { %112 = vmatpush.bf16.msra.mxu0 %v193_v6 }
  0x22   :  { %113 = vmatpush.bf16.msra.mxu0 %v192_v7 }
  0x25   :  { %114 = vmatmul.bf16.vlgmr.msra.gmra.mxu0 %v191_v8 }
  0xa2   :  { %v115_v10 = vpop.f32.mrf.mxu0 }
  0xa3   :  { %v116_v11 = vadd.f32 %v208_v9, %v115_v10 }
  0xa5   :  { %v122_v12 = vmul.f32 1.442695, %v116_v11  ;;  %vm120_vm2 = vcmp.gt.f32.partialorder %v116_v11, 20.0 }
  0xa7   :  { %209 = vpow2.f32 %v122_v12 }
  0xaa   :  { %v117_v13 = vpop.f32.mrf.mxu0 }
  0xab   :  { %v118_v14 = vadd.f32 %v208_v9, %v117_v13 }
  0xad   :  { %v210_v15 = vpop.eup %209  ;;  %v124_v16 = vmul.f32 1.442695, %v118_v14  ;;  %vm121_vm3 = vcmp.gt.f32.partialorder %v118_v14, 20.0 }
  0xae   :  { %v126_v17 = vadd.f32 1.0, %v210_v15  ;;  %v129_v19 = vmul.f32 -0.5, %v210_v15  ;;  %v132_v24 = vand.u32 2147483647, %v210_v15 }
  0xaf   :  { %211 = vpow2.f32 %v124_v16 }
  0xb0   :  { %213 = vlog2.f32 %v126_v17  ;;  %v130_v23 = vadd.f32 1.0, %v129_v19  ;;  %vm133_vm0 = vcmp.lt.f32.partialorder %v132_v24, 0.0004427343 }
  0xb2   :  { %v131_v28 = vmul.f32 %v210_v15, %v130_v23 }
  0xb5   :  { %v212_v18 = vpop.eup %211 }
  0xb6   :  { %v135_v20 = vadd.f32 1.0, %v212_v18  ;;  %v138_v21 = vmul.f32 -0.5, %v212_v18  ;;  %v214_v22 = vpop.eup %213  ;;  %v141_v27 = vand.u32 2147483647, %v212_v18 }
  0xb7   :  { %v128_v25 = vmul.f32 0.6931472, %v214_v22 }
  0xb8   :  { %215 = vlog2.f32 %v135_v20  ;;  %v139_v26 = vadd.f32 1.0, %v138_v21  ;;  %vm142_vm1 = vcmp.lt.f32.partialorder %v141_v27, 0.0004427343 }
  0xb9   :  { %v134_v30 = vsel %vm133_vm0, %v131_v28, %v128_v25 }
  0xba   :  { %v140_v32 = vmul.f32 %v212_v18, %v139_v26  ;;  %v144_v34 = vsel %vm120_vm2, %v116_v11, %v134_v30 }
  0xbe   :  { %v216_v29 = vpop.eup %215 }
  0xbf   :  { %v137_v31 = vmul.f32 0.6931472, %v216_v29 }
  0xc1   :  { %v143_v33 = vsel %vm142_vm1, %v140_v32, %v137_v31 }
  0xc2   :  { %v145_v35 = vsel %vm121_vm3, %v118_v14, %v143_v33 }
  0xc3   :  { %v203_v36 = vpack.c.bf16 %v145_v35, %v144_v34 }
  0xc5   :  { %204 = vst [vmem:[%s281_s3] sm:$0xff] %v203_v36  }
  0xc6   :  { %154 = vsyncpa [#allocation3], 1 }

</bundles_post_ra>
